<compile_context>
chip_gen: v7x
topology: tpu7x:2x2x1
jax: 0.10.0
libtpu: 0.0.40
codegen_flags: <defaults>
</compile_context>

<pallas_src>
import jax
import jax.numpy as jnp
from jax.experimental import pallas as pl
from jax.experimental.pallas import tpu as pltpu


def _mean_agg_kernel(m_ref, c_ref):
    # m_ref: (tile_nodes, K, tile_d) in VMEM
    # c_ref: (tile_nodes, tile_d)    in VMEM
    k = m_ref.shape[1]
    inv_k = 1.0 / k
    # Explicit f32 accumulation over the K neighbor slabs: plain VPU adds on
    # (tile_nodes, tile_d) slices — no full f32 copy of the 3-D block, no
    # cross-sublane XLU reduce, low vreg pressure even at large tiles.
    acc = m_ref[:, 0, :].astype(jnp.float32)
    if k <= 16:
        # Small static K (typical GNN mailbox) — fully unrolled slab adds.
        for j in range(1, k):
            acc = acc + m_ref[:, j, :].astype(jnp.float32)
    else:
        def body(j, a):
            return a + m_ref[:, j, :].astype(jnp.float32)
        acc = jax.lax.fori_loop(1, k, body, acc, unroll=8)
    c_ref[...] = (acc * inv_k).astype(c_ref.dtype)


def _round_up(x, m):
    return ((x + m - 1) // m) * m


def _vmem_capacity_bytes():
    """Best-effort physical VMEM query; conservative (v7x-sized) fallback."""
    try:
        info = pltpu.get_tpu_info()
        cap = getattr(info, "vmem_capacity_bytes", None)
        if cap:
            return int(cap)
    except Exception:
        pass
    return 64 << 20


def aggregator_forward(mailbox_m, *, tile_nodes=None, tile_d=None,
                       target_block_bytes=None):
    """Pallas equivalent of Aggregator.forward with mean `aggre`.

    mailbox_m: [num_nodes, num_neighbors, feat_dim]
    returns {'c': [num_nodes, feat_dim]}
    """
    n, k, d = mailbox_m.shape
    itemsize = jnp.dtype(mailbox_m.dtype).itemsize

    if k == 0:
        # torch.mean over an empty dim yields NaN.
        return {"c": jnp.full((n, d), jnp.nan, dtype=mailbox_m.dtype)}

    # Sublane packing: K is the block's second-to-last dim and is padded to
    # the per-dtype sublane multiple (8 for f32, 16 for bf16, 32 for int8).
    sublane_mult = 8 * max(1, 4 // itemsize)
    k_padded = _round_up(k, sublane_mult)

    # --- chip-generation-aware budgets -------------------------------------
    vmem_cap = _vmem_capacity_bytes()
    small_vmem_chip = vmem_cap <= (64 << 20)          # v7x-like (also 2 TCs)
    if small_vmem_chip:
        vmem_limit_cap = 38 << 20
        default_target = 12 << 20
    else:
        vmem_limit_cap = 80 << 20
        default_target = 16 << 20
    if target_block_bytes is None:
        target_block_bytes = default_target
    target_block_bytes = int(target_block_bytes)

    # --- feature-axis tiling: prefer full D (contiguous per-row DMA) --------
    if tile_d is None:
        row_bytes = k_padded * d * itemsize
        if d % 128 == 0 and row_bytes > (128 << 10):
            # Split only when a single node row is large; target ~64 KiB rows
            # so tile_nodes can stay comfortably >= 8 within the block budget.
            tile_d = max(128, ((64 << 10) // (k_padded * itemsize)) // 128 * 128)
            tile_d = min(tile_d, d)
        else:
            tile_d = d
    tile_d = int(tile_d)
    d_blocks = pl.cdiv(d, tile_d)

    # --- node-axis tiling: ~target_block_bytes input blocks, multiple of 8 --
    if tile_nodes is None:
        per_node_bytes = max(1, k_padded * tile_d * itemsize)
        tile_nodes = max(8, (target_block_bytes // per_node_bytes) // 8 * 8)
        tile_nodes = min(tile_nodes, _round_up(n, 8))
        if small_vmem_chip and d_blocks < 2 and n > 8:
            # v7x has 2 TensorCores: keep >= 2 grid blocks so both get work,
            # but only when the feature axis doesn't already provide them.
            # On single-TC v5e/v6e the grid is a serial loop, so never split.
            tile_nodes = min(tile_nodes, max(8, _round_up(pl.cdiv(n, 2), 8)))
    tile_nodes = int(tile_nodes)

    grid = (pl.cdiv(n, tile_nodes), d_blocks)

    # VMEM budget: double-buffered input + output blocks plus headroom,
    # capped per chip generation (leave headroom on v7x's 64 MiB).
    in_block_bytes = tile_nodes * k_padded * tile_d * itemsize
    out_block_bytes = _round_up(tile_nodes, sublane_mult) * tile_d * itemsize
    vmem_limit = int(2 * (in_block_bytes + out_block_bytes) + (8 << 20))
    vmem_limit = min(max(vmem_limit, 32 << 20), vmem_limit_cap)

    cost = pl.CostEstimate(
        flops=n * k * d,
        transcendentals=0,
        bytes_accessed=(n * k * d + n * d) * itemsize,
    )

    c = pl.pallas_call(
        _mean_agg_kernel,
        out_shape=jax.ShapeDtypeStruct((n, d), mailbox_m.dtype),
        grid_spec=pltpu.PrefetchScalarGridSpec(
            num_scalar_prefetch=0,
            grid=grid,
            in_specs=[
                pl.BlockSpec((tile_nodes, k, tile_d), lambda i, j: (i, 0, j)),
            ],
            out_specs=pl.BlockSpec((tile_nodes, tile_d), lambda i, j: (i, j)),
        ),
        compiler_params=pltpu.CompilerParams(
            dimension_semantics=("parallel", "parallel"),
            vmem_limit_bytes=vmem_limit,
        ),
        cost_estimate=cost,
    )(mailbox_m)
    return {"c": c}


if __name__ == "__main__":
    key = jax.random.PRNGKey(0)
    k0, k1, k2, k3 = jax.random.split(key, 4)

    # Small example consistent with a DGL mailbox: [nodes, neighbors, feat].
    num_nodes, num_neighbors, feat_dim = 16, 8, 128
    mailbox_m = jax.random.normal(
        k0, (num_nodes, num_neighbors, feat_dim), dtype=jnp.float32
    )
    out = aggregator_forward(mailbox_m)
    c = jax.block_until_ready(out["c"])
    ref = jnp.mean(mailbox_m, axis=1)
    assert c.shape == (num_nodes, feat_dim)
    assert jnp.allclose(c, ref, atol=1e-5, rtol=1e-5)

    # Edge-block case: num_nodes not a multiple of the tile size.
    mailbox_m2 = jax.random.normal(k1, (20, 8, 128), dtype=jnp.float32)
    c2 = jax.block_until_ready(aggregator_forward(mailbox_m2)["c"])
    ref2 = jnp.mean(mailbox_m2, axis=1)
    assert c2.shape == (20, 128)
    assert jnp.allclose(c2, ref2, atol=1e-5, rtol=1e-5)

    # Non-multiple-of-128 feature width (full-D block, masked output stores).
    mailbox_m3 = jax.random.normal(k2, (10, 5, 96), dtype=jnp.float32)
    c3 = jax.block_until_ready(aggregator_forward(mailbox_m3)["c"])
    ref3 = jnp.mean(mailbox_m3, axis=1)
    assert c3.shape == (10, 96)
    assert jnp.allclose(c3, ref3, atol=1e-5, rtol=1e-5)

    # bf16 mailbox: exercises the sublane-padded-K VMEM sizing path.
    mailbox_m4 = jax.random.normal(
        k3, (24, 8, 128), dtype=jnp.float32).astype(jnp.bfloat16)
    c4 = jax.block_until_ready(aggregator_forward(mailbox_m4)["c"])
    ref4 = jnp.mean(mailbox_m4.astype(jnp.float32), axis=1).astype(jnp.bfloat16)
    assert c4.shape == (24, 128)
    assert jnp.allclose(c4.astype(jnp.float32), ref4.astype(jnp.float32),
                        atol=2e-2, rtol=2e-2)

    print("KERNEL_OK")
</pallas_src>

<mosaic_0001>
module attributes {stable_mosaic.version = 11 : i64} {
  func.func @_mean_agg_kernel(%arg0: i32, %arg1: i32, %arg2: memref<8x8x128xf32, #tpu.memory_space<vmem>>, %arg3: memref<8x128xf32, #tpu.memory_space<vmem>>) attributes {dimension_semantics = [#tpu.dimension_semantics<parallel>, #tpu.dimension_semantics<parallel>], iteration_bounds = array<i64: 2, 1>, scalar_prefetch = 0 : i64, scratch_operands = 0 : i64, tpu.core_type = #tpu.core_type<tc>, window_params = [{transform_indices = @transform_0, window_bounds = array<i64: 8, 8, 128>}, {transform_indices = @transform_1, window_bounds = array<i64: 8, 128>}]} {
    %c0 = arith.constant 0 : index
    %c0_0 = arith.constant 0 : index
    %c0_1 = arith.constant 0 : index
    %0 = vector.load %arg2[%c0, %c0_0, %c0_1] : memref<8x8x128xf32, #tpu.memory_space<vmem>>, vector<8x1x128xf32>
    %1 = vector.shape_cast %0 : vector<8x1x128xf32> to vector<8x128xf32>
    %c0_2 = arith.constant 0 : index
    %c1 = arith.constant 1 : index
    %c0_3 = arith.constant 0 : index
    %2 = vector.load %arg2[%c0_2, %c1, %c0_3] : memref<8x8x128xf32, #tpu.memory_space<vmem>>, vector<8x1x128xf32>
    %3 = vector.shape_cast %2 : vector<8x1x128xf32> to vector<8x128xf32>
    %4 = arith.addf %1, %3 : vector<8x128xf32>
    %c0_4 = arith.constant 0 : index
    %c2 = arith.constant 2 : index
    %c0_5 = arith.constant 0 : index
    %5 = vector.load %arg2[%c0_4, %c2, %c0_5] : memref<8x8x128xf32, #tpu.memory_space<vmem>>, vector<8x1x128xf32>
    %6 = vector.shape_cast %5 : vector<8x1x128xf32> to vector<8x128xf32>
    %7 = arith.addf %4, %6 : vector<8x128xf32>
    %c0_6 = arith.constant 0 : index
    %c3 = arith.constant 3 : index
    %c0_7 = arith.constant 0 : index
    %8 = vector.load %arg2[%c0_6, %c3, %c0_7] : memref<8x8x128xf32, #tpu.memory_space<vmem>>, vector<8x1x128xf32>
    %9 = vector.shape_cast %8 : vector<8x1x128xf32> to vector<8x128xf32>
    %10 = arith.addf %7, %9 : vector<8x128xf32>
    %c0_8 = arith.constant 0 : index
    %c4 = arith.constant 4 : index
    %c0_9 = arith.constant 0 : index
    %11 = vector.load %arg2[%c0_8, %c4, %c0_9] : memref<8x8x128xf32, #tpu.memory_space<vmem>>, vector<8x1x128xf32>
    %12 = vector.shape_cast %11 : vector<8x1x128xf32> to vector<8x128xf32>
    %13 = arith.addf %10, %12 : vector<8x128xf32>
    %c0_10 = arith.constant 0 : index
    %c5 = arith.constant 5 : index
    %c0_11 = arith.constant 0 : index
    %14 = vector.load %arg2[%c0_10, %c5, %c0_11] : memref<8x8x128xf32, #tpu.memory_space<vmem>>, vector<8x1x128xf32>
    %15 = vector.shape_cast %14 : vector<8x1x128xf32> to vector<8x128xf32>
    %16 = arith.addf %13, %15 : vector<8x128xf32>
    %c0_12 = arith.constant 0 : index
    %c6 = arith.constant 6 : index
    %c0_13 = arith.constant 0 : index
    %17 = vector.load %arg2[%c0_12, %c6, %c0_13] : memref<8x8x128xf32, #tpu.memory_space<vmem>>, vector<8x1x128xf32>
    %18 = vector.shape_cast %17 : vector<8x1x128xf32> to vector<8x128xf32>
    %19 = arith.addf %16, %18 : vector<8x128xf32>
    %c0_14 = arith.constant 0 : index
    %c7 = arith.constant 7 : index
    %c0_15 = arith.constant 0 : index
    %20 = vector.load %arg2[%c0_14, %c7, %c0_15] : memref<8x8x128xf32, #tpu.memory_space<vmem>>, vector<8x1x128xf32>
    %21 = vector.shape_cast %20 : vector<8x1x128xf32> to vector<8x128xf32>
    %22 = arith.addf %19, %21 : vector<8x128xf32>
    %cst = arith.constant 1.250000e-01 : f32
    %23 = vector.broadcast %cst : f32 to vector<8x128xf32>
    %24 = arith.mulf %22, %23 : vector<8x128xf32>
    %c0_16 = arith.constant 0 : index
    %c0_17 = arith.constant 0 : index
    %25 = vector.load %arg3[%c0_16, %c0_17] : memref<8x128xf32, #tpu.memory_space<vmem>>, vector<8x128xf32>
    tpu.vector_store %arg3[%c0_16, %c0_17], %24 {strides = array<i32>} : memref<8x128xf32, #tpu.memory_space<vmem>>, vector<8x128xf32>,
    return
  }
  func.func @transform_0(%arg0: i32, %arg1: i32) -> (i32, i32, i32) {
    %c0_i32 = arith.constant 0 : i32
    %c0_i32_0 = arith.constant 0 : i32
    return %arg0, %c0_i32, %arg1 : i32, i32, i32
  }
  func.func @transform_1(%arg0: i32, %arg1: i32) -> (i32, i32) {
    %c0_i32 = arith.constant 0 : i32
    return %arg0, %arg1 : i32, i32
  }
}

</mosaic_0001>

<bundles_post_ra>
// kernel: tpu_custom_call.1
= control target key start
LH: loop header
LB: loop body
LE: loop exit
PB: predicated region body
PF: predicated region fallthrough
CT: control target
= control target key end

     0   :  { %6 = vsyncpa [#allocation3], 0  ;;  %s856_s0 = inlined_call_operand.hbm [shape: f32[16,8,128], index: 0, kind: input, shape index: {}]   ;;  %s857_s1 = inlined_call_operand.hbm [shape: f32[16,128], index: 1, kind: output, shape index: {}]  }
   0x1   :  { %8 = vsyncpa [#allocation3 + $0x1], 0 }
   0x2   :  { %9 = vsyncpa [#allocation4], 0 }
   0x3   :  { %11 = vsyncpa [#allocation4 + $0x1], 0  ;;  %s615_s6 = smov 0   ;;  %s617_s7 = smov 0  }
   0x4   :  { %s619_s8 = smov 0   ;;  %s621_s9 = smov 0  }
   0x5   :  { %s623_s10 = smov 0   ;;  %s625_s11 = smov 0  }
   0x6 LB: > { %s408_s12 = sadd.s32 4294967295, %s599_s11   ;;  %s409_s13 = sadd.s32 4294967294, %s599_s11   ;;  %s599_s11 = sphi %s625_s11, %s17_s11   ;;  %s595_s10 = sphi %s623_s10, %s872_s10   ;;  %s591_s9 = sphi %s621_s9, %s871_s9   ;;  %s587_s8 = sphi %s619_s8, %s870_s8   ;;  %s583_s7 = sphi %s617_s7, %s869_s7   ;;  %s579_s6 = sphi %s615_s6, %s868_s6  }
   0x7   : > { %s29_s14 = sadd.s32 1, %s595_s10  ;;  %s38_s15 = sadd.s32 1, %s587_s8 }
   0x8   : > { %p31_p0 = scmp.ge.s32.totalorder %s29_s14, 2  ;;  %p45_p1 = scmp.ne.s32.totalorder %s587_s8, %s583_s7 }
   0x9   : > { %p46_p2 = scmp.eq.s32.totalorder %s599_s11, 0  ;;  %p51_p3 = scmp.ne.s32.totalorder %s583_s7, %s579_s6 }
   0xa   : > { %s874_s14 = smov (%p31_p0, %s29_s14), 0  ;;  %p52_p5 = scmp.eq.s32.totalorder %s408_s12, 0 }
   0xb   : > { %p656_p4 = por %p46_p2, %p45_p1  ;;  %s33_s17 = ssub.s32 %s595_s10, %s874_s14 }
   0xc   : > { %p77_p6 = scmp.eq.s32.totalorder %s408_s12, 1  ;;  %p36_p7 = scmp.eq.s32.totalorder %s33_s17, 0 }
   0xd   : > { %p662_p8 = por %p52_p5, %p51_p3  ;;  %p83_p10 = scmp.eq.s32.totalorder %s409_s13, 1 }
   0xe   : > { %p666_p9 = por %p77_p6, %p45_p1  ;;  %p435_p13 = scmp.lt.s32.totalorder %s599_s11, 2 }
   0xf   : > { %s671_s20 = scalar_select %p36_p7, %s587_s8, %s38_s15  }
  0x10   : > { %s861_s19 = scalar_select %p666_p9, 1, 0 }
  0x11   : > { %p673_p11 = por %p83_p10, %p51_p3  ;;  %s103_s22 = sand.u32 1, %s587_s8  }
  0x12   : > { %s412_s23 = sshll.u32 %s103_s22, 6  ;;  %s422_s24 = sshll.u32 %s595_s10, 10 }
  0x13   : > { %s862_s21 = scalar_select %p673_p11, 1, 0 }
  0x14   : > { %s684_s27 = scalar_lea.hbm %s856_s0, %s422_s24  ;;  %s107_s28 = scalar_lea.vmem [#allocation2], %s412_s23 }
  0x15   : > { %s115_s29 = sshll.u32 %s107_s28, 4  ;;  %p690_p0 = pnand %p435_p13, %p656_p4  ;;  %s686_s29 = int_to_ptr.vmem [resolvable:$true] %s115_s29 }
  0x16   : > { %s695_s2 = scalar_lea.sflag [#allocation3], %s103_s22  ;;  %s487_s3 = scalar_lea.hbm %s684_s27, 1024 }
  0x17   : > { %p488_p2 = scmp.ne.s32.totalorder %s684_s27, %s487_s3  ;;  %p489_p3 = pneg %p690_p0 }
  0x18   : > { %s492_s12 = scalar_lea.hbm %s856_s0, 2048  ;;  %p493_p4 = scmp.lt.u32.totalorder %s684_s27, %s856_s0 }
  0x19   : > { %p490_p5 = pnand %p489_p3, %p488_p2  ;;  %p494_p7 = scmp.lt.u32.totalorder %s492_s12, %s487_s3 }
  0x1a   : > { %p496_p13 = scmp.lt.u32.totalorder %s487_s3, %s684_s27 }
  0x1b   : > { %p491_p6 = pneg %p490_p5  ;;  %p495_p10 = por %p494_p7, %p493_p4 }
  0x1d   : > { %p497_p12 = por %p496_p13, %p495_p10 }
  0x1f   : > { %p498_p1 = pnand %p497_p12, %p491_p6 }
  0x21   : > { %501 = shalt.err (!%p498_p1)
}
  0x22   : > { %s502_s16 = scalar_lea.vmem %s686_s29, 1024  ;;  %s601_s17 = smov [#allocation2]  }
  0x23   : > { %p503_p2 = scmp.ne.s32.totalorder %s686_s29, %s502_s16  ;;  %s507_s22 = sshll.u32 %s601_s17, 4  ;;  %s508_s22 = int_to_ptr.vmem [resolvable:$false] %s507_s22 }
  0x24   : > { %s509_s23 = scalar_lea.vmem %s508_s22, 2048  ;;  %p510_p9 = scmp.lt.s32.totalorder %s686_s29, %s508_s22 }
  0x25   : > { %p505_p5 = pnand %p503_p2, %p489_p3  ;;  %p511_p4 = scmp.lt.s32.totalorder %s509_s23, %s502_s16 }
  0x27   : > { %p506_p11 = pneg %p505_p5  ;;  %p512_p7 = por %p511_p4, %p510_p9 }
  0x29   : > { %p513_p10 = pnand %p512_p7, %p506_p11 }
  0x2b   : > { %516 = shalt.err (!%p513_p10)
}
  0x2c   : > { %s602_s24 = smov 128   ;;  %s603_s25 = smov 8  }
  0x2d   : > { %430 = dma.hbm_to_vmem [thread:$0]  (!%p690_p0), %s684_s27, 1024, %s686_s29, %s695_s2, %s602_s24, %s602_s24, %s603_s25  }
  0x2e   : > { %p123_p12 = scmp.lt.s32.totalorder %s599_s11, 3  ;;  %p864_p1 = scmp.ge.s32.totalorder %s599_s11, 1 }
  0x30   : > { %p124_p3 = pnand %p864_p1, %p123_p12 }
  0x31   : > { %s727_s26 = sand.u32 (!%p124_p3), 1, %s583_s7  }
  0x32   : > { %127 = sbr.rel (%p124_p3) target bundleno = 106 (0x6a), region = 24  ;;  %s416_s28 = sshll.u32 (!%p124_p3), %s727_s26, 6 }
  0x33   : > { %s130_s3 = scalar_lea.sflag (!%p124_p3), [#allocation3], %s727_s26  ;;  %s731_s4 = scalar_lea.vmem (!%p124_p3), [#allocation2], %s416_s28 }
  0x39   : > { %570 = dma.done.wait (%p662_p8), %s130_s3, 1024  }
  0x3a   : > { %572 = vsyncadd (%p662_p8), %s130_s3, 4294966272  ;;  %v153_v0 = vld [vmem:[%s731_s4] sm:$0x1]  ;;  %v154_v1 = vld [vmem:[%s731_s4 + $0x8] sm:$0x1]  ;;  %vm290_vm0 = vcmask 1041409  }
  0x3b   : > { %v155_v2 = vld [vmem:[%s731_s4 + $0x10] sm:$0x1]  ;;  %v156_v3 = vld [vmem:[%s731_s4 + $0x18] sm:$0x1]  ;;  %v157_v4 = vld [vmem:[%s731_s4 + $0x20] sm:$0x1] }
  0x3c   : > { %v158_v5 = vld [vmem:[%s731_s4 + $0x28] sm:$0x1]  ;;  %v159_v6 = vld [vmem:[%s731_s4 + $0x30] sm:$0x1]  ;;  %v160_v7 = vld [vmem:[%s731_s4 + $0x38] sm:$0x1] }
  0x3d   : > { %v161_v8 = vld [vmem:[%s731_s4 + $0x1] sm:$0x1]  ;;  %v162_v9 = vld [vmem:[%s731_s4 + $0x9] sm:$0x1]  ;;  %v163_v10 = vld [vmem:[%s731_s4 + $0x11] sm:$0x1] }
  0x3e   : > { %v164_v11 = vld [vmem:[%s731_s4 + $0x19] sm:$0x1]  ;;  %v169_v12 = vadd.f32 %v161_v8, %v153_v0  ;;  %v165_v13 = vld [vmem:[%s731_s4 + $0x21] sm:$0x1]  ;;  %v166_v14 = vld [vmem:[%s731_s4 + $0x29] sm:$0x1]  ;;  %v170_v16 = vadd.f32 %v162_v9, %v154_v1  ;;  %v171_v17 = vadd.f32 %v163_v10, %v155_v2 }
  0x3f   : > { %v167_v15 = vld [vmem:[%s731_s4 + $0x31] sm:$0x1]  ;;  %v172_v18 = vadd.f32 %v164_v11, %v156_v3  ;;  %v168_v19 = vld [vmem:[%s731_s4 + $0x39] sm:$0x1]  ;;  %v173_v20 = vadd.f32 %v165_v13, %v157_v4  ;;  %v174_v21 = vadd.f32 %v166_v14, %v158_v5  ;;  %v177_v23 = vld [vmem:[%s731_s4 + $0x2] sm:$0x1] }
  0x40   : > { %v175_v22 = vadd.f32 %v167_v15, %v159_v6  ;;  %v178_v24 = vld [vmem:[%s731_s4 + $0xa] sm:$0x1]  ;;  %v176_v25 = vadd.f32 %v168_v19, %v160_v7  ;;  %v179_v26 = vld [vmem:[%s731_s4 + $0x12] sm:$0x1]  ;;  %v180_v27 = vld [vmem:[%s731_s4 + $0x1a] sm:$0x1]  ;;  %v185_v29 = vadd.f32 %v177_v23, %v169_v12 }
  0x41   : > { %v181_v28 = vld [vmem:[%s731_s4 + $0x22] sm:$0x1]  ;;  %v186_v30 = vadd.f32 %v178_v24, %v170_v16  ;;  %v182_v31 = vld [vmem:[%s731_s4 + $0x2a] sm:$0x1]  ;;  %v183_v32 = vld [vmem:[%s731_s4 + $0x32] sm:$0x1]  ;;  %v187_v34 = vadd.f32 %v179_v26, %v171_v17  ;;  %v188_v35 = vadd.f32 %v180_v27, %v172_v18 }
  0x42   : > { %v184_v33 = vld [vmem:[%s731_s4 + $0x3a] sm:$0x1]  ;;  %v189_v36 = vadd.f32 %v181_v28, %v173_v20  ;;  %v190_v37 = vadd.f32 %v182_v31, %v174_v21  ;;  %v191_v38 = vadd.f32 %v183_v32, %v175_v22  ;;  %v193_v40 = vld [vmem:[%s731_s4 + $0x3] sm:$0x1]  ;;  %v194_v41 = vld [vmem:[%s731_s4 + $0xb] sm:$0x1] }
  0x43   : > { %v192_v39 = vadd.f32 %v184_v33, %v176_v25  ;;  %v195_v42 = vld [vmem:[%s731_s4 + $0x13] sm:$0x1]  ;;  %v196_v43 = vld [vmem:[%s731_s4 + $0x1b] sm:$0x1]  ;;  %v197_v44 = vld [vmem:[%s731_s4 + $0x23] sm:$0x1]  ;;  %v201_v46 = vadd.f32 %v193_v40, %v185_v29  ;;  %v202_v47 = vadd.f32 %v194_v41, %v186_v30 }
  0x44   : > { %v198_v45 = vld [vmem:[%s731_s4 + $0x2b] sm:$0x1]  ;;  %v203_v48 = vadd.f32 %v195_v42, %v187_v34  ;;  %v199_v49 = vld [vmem:[%s731_s4 + $0x33] sm:$0x1]  ;;  %v200_v50 = vld [vmem:[%s731_s4 + $0x3b] sm:$0x1]  ;;  %v204_v51 = vadd.f32 %v196_v43, %v188_v35  ;;  %v205_v52 = vadd.f32 %v197_v44, %v189_v36 }
  0x45   : > { %v206_v53 = vadd.f32 %v198_v45, %v190_v37  ;;  %v209_v54 = vld [vmem:[%s731_s4 + $0x4] sm:$0x1]  ;;  %v207_v55 = vadd.f32 %v199_v49, %v191_v38  ;;  %v208_v56 = vadd.f32 %v200_v50, %v192_v39  ;;  %v210_v57 = vld [vmem:[%s731_s4 + $0xc] sm:$0x1]  ;;  %v211_v58 = vld [vmem:[%s731_s4 + $0x14] sm:$0x1] }
  0x46   : > { %v212_v59 = vld [vmem:[%s731_s4 + $0x1c] sm:$0x1]  ;;  %v217_v60 = vadd.f32 %v209_v54, %v201_v46  ;;  %v213_v61 = vld [vmem:[%s731_s4 + $0x24] sm:$0x1]  ;;  %v214_v62 = vld [vmem:[%s731_s4 + $0x2c] sm:$0x1]  ;;  %v218_v0 = vadd.f32 %v210_v57, %v202_v47  ;;  %v219_v1 = vadd.f32 %v211_v58, %v203_v48 }
  0x47   : > { %v215_v63 = vld [vmem:[%s731_s4 + $0x34] sm:$0x1]  ;;  %v220_v2 = vadd.f32 %v212_v59, %v204_v51  ;;  %v216_v3 = vld [vmem:[%s731_s4 + $0x3c] sm:$0x1]  ;;  %v221_v4 = vadd.f32 %v213_v61, %v205_v52  ;;  %v222_v5 = vadd.f32 %v214_v62, %v206_v53  ;;  %v225_v7 = vld [vmem:[%s731_s4 + $0x5] sm:$0x1] }
  0x48   : > { %v223_v6 = vadd.f32 %v215_v63, %v207_v55  ;;  %v226_v8 = vld [vmem:[%s731_s4 + $0xd] sm:$0x1]  ;;  %v224_v9 = vadd.f32 %v216_v3, %v208_v56  ;;  %v227_v10 = vld [vmem:[%s731_s4 + $0x15] sm:$0x1]  ;;  %v228_v11 = vld [vmem:[%s731_s4 + $0x1d] sm:$0x1]  ;;  %v233_v13 = vadd.f32 %v225_v7, %v217_v60 }
  0x49   : > { %v229_v12 = vld [vmem:[%s731_s4 + $0x25] sm:$0x1]  ;;  %v234_v14 = vadd.f32 %v226_v8, %v218_v0  ;;  %v230_v15 = vld [vmem:[%s731_s4 + $0x2d] sm:$0x1]  ;;  %v231_v16 = vld [vmem:[%s731_s4 + $0x35] sm:$0x1]  ;;  %v235_v18 = vadd.f32 %v227_v10, %v219_v1  ;;  %v236_v19 = vadd.f32 %v228_v11, %v220_v2 }
  0x4a   : > { %v232_v17 = vld [vmem:[%s731_s4 + $0x3d] sm:$0x1]  ;;  %v237_v20 = vadd.f32 %v229_v12, %v221_v4  ;;  %v238_v21 = vadd.f32 %v230_v15, %v222_v5  ;;  %v239_v22 = vadd.f32 %v231_v16, %v223_v6  ;;  %v241_v24 = vld [vmem:[%s731_s4 + $0x6] sm:$0x1]  ;;  %v242_v25 = vld [vmem:[%s731_s4 + $0xe] sm:$0x1] }
  0x4b   : > { %v240_v23 = vadd.f32 %v232_v17, %v224_v9  ;;  %v243_v26 = vld [vmem:[%s731_s4 + $0x16] sm:$0x1]  ;;  %v244_v27 = vld [vmem:[%s731_s4 + $0x1e] sm:$0x1]  ;;  %v245_v28 = vld [vmem:[%s731_s4 + $0x26] sm:$0x1]  ;;  %v249_v30 = vadd.f32 %v241_v24, %v233_v13  ;;  %v250_v31 = vadd.f32 %v242_v25, %v234_v14 }
  0x4c   : > { %v246_v29 = vld [vmem:[%s731_s4 + $0x2e] sm:$0x1]  ;;  %v251_v32 = vadd.f32 %v243_v26, %v235_v18  ;;  %v247_v33 = vld [vmem:[%s731_s4 + $0x36] sm:$0x1]  ;;  %v248_v34 = vld [vmem:[%s731_s4 + $0x3e] sm:$0x1]  ;;  %v252_v35 = vadd.f32 %v244_v27, %v236_v19  ;;  %v253_v36 = vadd.f32 %v245_v28, %v237_v20 }
  0x4d   : > { %v254_v37 = vadd.f32 %v246_v29, %v238_v21  ;;  %v257_v38 = vld [vmem:[%s731_s4 + $0x7] sm:$0x1]  ;;  %v255_v39 = vadd.f32 %v247_v33, %v239_v22  ;;  %v256_v40 = vadd.f32 %v248_v34, %v240_v23  ;;  %v258_v41 = vld [vmem:[%s731_s4 + $0xf] sm:$0x1]  ;;  %v259_v42 = vld [vmem:[%s731_s4 + $0x17] sm:$0x1] }
  0x4e   : > { %v260_v43 = vld [vmem:[%s731_s4 + $0x1f] sm:$0x1]  ;;  %v265_v44 = vadd.f32 %v257_v38, %v249_v30  ;;  %v261_v45 = vld [vmem:[%s731_s4 + $0x27] sm:$0x1]  ;;  %v262_v46 = vld [vmem:[%s731_s4 + $0x2f] sm:$0x1]  ;;  %v266_v48 = vadd.f32 %v258_v41, %v250_v31  ;;  %v267_v49 = vadd.f32 %v259_v42, %v251_v32 }
  0x4f   : > { %v263_v47 = vld [vmem:[%s731_s4 + $0x37] sm:$0x1]  ;;  %v268_v50 = vadd.f32 %v260_v43, %v252_v35  ;;  %v264_v51 = vld [vmem:[%s731_s4 + $0x3f] sm:$0x1]  ;;  %v269_v52 = vadd.f32 %v261_v45, %v253_v36  ;;  %v270_v53 = vadd.f32 %v262_v46, %v254_v37  ;;  %s417_s18 = sshll.u32 %s727_s26, 3  ;;  %vm293_vm1 = vcmask 1042434  }
  0x50   : > { %v271_v54 = vadd.f32 %v263_v47, %v255_v39  ;;  %v273_v55 = vmul.f32 0.125, %v265_v44  ;;  %v272_v56 = vadd.f32 %v264_v51, %v256_v40  ;;  %v274_v57 = vmul.f32 0.125, %v266_v48  ;;  %s151_s27 = scalar_lea.vmem [#allocation5], %s417_s18  ;;  %s419_s30 = sshll.u32 %s591_s9, 7 }
  0x51   : > { %v275_v58 = vmul.f32 0.125, %v267_v49  ;;  %v276_v59 = vmul.f32 0.125, %v268_v50  ;;  %v277_v60 = vmul.f32 0.125, %v269_v52  ;;  %v278_v61 = vmul.f32 0.125, %v270_v53  ;;  %s327_s29 = sshll.u32 %s151_s27, 4  ;;  %s809_s12 = scalar_lea.hbm %s857_s1, %s419_s30  ;;  %s804_s29 = int_to_ptr.vmem [resolvable:$true] %s327_s29 }
  0x52   : > { %v279_v62 = vmul.f32 0.125, %v271_v54  ;;  %v280_v63 = vmul.f32 0.125, %v272_v56  ;;  %v289_v0 = vrot.slane %v274_v57, 7  ;;  %vm296_vm2 = vcmask 1043459   ;;  %s313_s13 = scalar_lea.sflag [#allocation4], %s727_s26  ;;  %s517_s15 = scalar_lea.vmem %s804_s29, 128 }
  0x53   : > { %v292_v1 = vrot.slane %v275_v58, 6  ;;  %v295_v2 = vrot.slane %v276_v59, 5  ;;  %v298_v3 = vrot.slane %v277_v60, 4  ;;  %vm299_vm3 = vcmask 1044484   ;;  %p518_p8 = scmp.ne.s32.totalorder %s804_s29, %s517_s15  ;;  %p865_p9 = scmp.ne.s32.totalorder %s861_s19, 0 }
  0x54   : > { %v291_v4 = vsel %vm290_vm0, %v289_v0, %v273_v55  ;;  %v301_v5 = vrot.slane %v278_v61, 3  ;;  %vm302_vm4 = vcmask 1045509   ;;  %v304_v7 = vrot.slane %v279_v62, 2  ;;  %s604_s9 = smov [#allocation5]  }
  0x55   : > { %v294_v6 = vsel %vm293_vm1, %v292_v1, %v291_v4  ;;  %vm305_vm5 = vcmask 1046534   ;;  %v307_v9 = vrot.slane %v280_v63, 1  ;;  %vm308_vm6 = vcmask 1047559   ;;  %p519_p11 = pnand %p518_p8, %p865_p9  ;;  %s521_s16 = sshll.u32 %s604_s9, 4  ;;  %s522_s16 = int_to_ptr.vmem [resolvable:$false] %s521_s16 }
  0x56   : > { %v297_v8 = vsel %vm296_vm2, %v295_v2, %v294_v6  ;;  %s523_s17 = scalar_lea.vmem %s522_s16, 256  ;;  %p524_p6 = scmp.lt.s32.totalorder %s804_s29, %s522_s16 }
  0x57   : > { %v300_v10 = vsel %vm299_vm3, %v298_v3, %v297_v8  ;;  %p520_p0 = pneg %p519_p11  ;;  %p525_p13 = scmp.lt.s32.totalorder %s523_s17, %s517_s15 }
  0x58   : > { %v303_v11 = vsel %vm302_vm4, %v301_v5, %v300_v10 }
  0x59   : > { %v306_v12 = vsel %vm305_vm5, %v304_v7, %v303_v11  ;;  %p526_p2 = por %p525_p13, %p524_p6 }
  0x5a   : > { %v309_v13 = vsel %vm308_vm6, %v307_v9, %v306_v12 }
  0x5b   : > { %311 = vst [vmem:[%s151_s27] sm:$0xff] %v309_v13  ;;  %p527_p5 = pnand %p526_p2, %p520_p0 }
  0x5d   : > { %530 = shalt.err (!%p527_p5)
}
  0x5e   : > { %s531_s22 = scalar_lea.hbm %s809_s12, 128  ;;  %s535_s25 = scalar_lea.hbm %s857_s1, 256 }
  0x5f   : > { %p532_p4 = scmp.ne.s32.totalorder %s809_s12, %s531_s22  ;;  %p536_p12 = scmp.lt.u32.totalorder %s809_s12, %s857_s1 }
  0x60   : > { %p537_p1 = scmp.lt.u32.totalorder %s535_s25, %s531_s22  ;;  %p539_p8 = scmp.lt.u32.totalorder %s531_s22, %s809_s12 }
  0x61   : > { %p533_p7 = pnand %p532_p4, %p865_p9 }
  0x62   : > { %p538_p3 = por %p537_p1, %p536_p12 }
  0x63   : > { %p534_p10 = pneg %p533_p7 }
  0x64   : > { %p540_p11 = por %p539_p8, %p538_p3 }
  0x66   : > { %p541_p0 = pnand %p540_p11, %p534_p10 }
  0x68   : > { %544 = shalt.err (!%p541_p0)
}
  0x69   : > { %425 = dma.vmem_to_hbm [thread:$0]  (%p865_p9), %s804_s29, 128, %s809_s12, %s313_s13  }
  0x6a PF: > { %s339_s3 = sand.u32 1, %s579_s6   ;;  %p866_p6 = scmp.ne.s32.totalorder %s862_s21, 0 }
  0x6b   : > { %p867_p13 = scmp.ge.s32.totalorder %s599_s11, 2  ;;  %s340_s4 = scalar_lea.sflag [#allocation4], %s339_s3 }
  0x6d   : > { %p432_p2 = pnand %p867_p13, %p866_p6 }
  0x6f   : > { %574 = dma.done.wait (!%p432_p2), %s340_s4, 128  }
  0x70   : > { %576 = vsyncadd (!%p432_p2), %s340_s4, 4294967168  ;;  %s17_s11 = sadd.s32 1, %s599_s11   ;;  %s868_s6 = smov %s583_s7 }
  0x71   : > { %p14_p5 = scmp.ge.s32.totalorder %s17_s11, 4   ;;  %s869_s7 = smov %s587_s8 }
  0x72   : > { %s870_s8 = smov %s671_s20  ;;  %s871_s9 = smov %s595_s10 }
  0x73   : > { %s872_s10 = smov %s874_s14  ;;  %16 = sbr.rel (!%p14_p5) target bundleno = 6 (0x6), region = 69 }
  0x7a   :  { %345 = vsyncpa [#allocation3], 1 }
  0x7b   :  { %347 = vsyncpa [#allocation3 + $0x1], 1 }
  0x7c   :  { %348 = vsyncpa [#allocation4], 1 }
  0x7d   :  { %350 = vsyncpa [#allocation4 + $0x1], 1 }

</bundles_post_ra>
